<compile_context>
chip_gen: v7x
topology: tpu7x:2x2x1
jax: 0.10.0
libtpu: 0.0.40
codegen_flags: <defaults>
</compile_context>

<pallas_src>
import functools

import numpy as np
import jax
import jax.numpy as jnp
from jax import lax
from jax.experimental import pallas as pl
from jax.experimental.pallas import tpu as pltpu

LEAKY_SLOPE = 0.01  # nn.LeakyReLU default negative_slope
VMEM_LIMIT = 32 * 1024 * 1024


def _round_up(x, m):
    return ((x + m - 1) // m) * m


def _leaky(y):
    return jnp.where(y >= 0.0, y, LEAKY_SLOPE * y)


# ----------------------------------------------------------------------------
# Pallas kernels
# ----------------------------------------------------------------------------
def _matmul_bias_act_kernel(x_ref, w_ref, b_ref, o_ref, *, act):
    y = jnp.dot(x_ref[...], w_ref[...], preferred_element_type=jnp.float32)
    y = y + b_ref[...]
    if act == "leaky_relu":
        y = _leaky(y)
    o_ref[...] = y.astype(o_ref.dtype)


def matmul_bias_act(x, w_p, b_p, act="none", out_dtype=jnp.float32):
    """y = act(x @ w + b).

    x:(M,K) any float; w_p:(Kp,Np) bf16 pre-padded; b_p:(1,Np) f32 pre-padded.
    Returns (M, Np) in out_dtype (rows sliced back to M, the 128-padded channel
    axis is kept so chained layers never re-pad).  bf16 MXU operands + f32 acc.
    """
    M, K = x.shape
    Kp, Np = w_p.shape
    row_block = 256 if M >= 512 else 128
    Mp = _round_up(M, row_block)
    xb = x.astype(jnp.bfloat16)
    if (Mp, Kp) != (M, K):
        xb = jnp.pad(xb, ((0, Mp - M), (0, Kp - K)))

    out = pl.pallas_call(
        functools.partial(_matmul_bias_act_kernel, act=act),
        out_shape=jax.ShapeDtypeStruct((Mp, Np), out_dtype),
        grid=(Mp // row_block,),
        in_specs=[
            pl.BlockSpec((row_block, Kp), lambda i: (i, 0)),
            pl.BlockSpec((Kp, Np), lambda i: (0, 0)),
            pl.BlockSpec((1, Np), lambda i: (0, 0)),
        ],
        out_specs=pl.BlockSpec((row_block, Np), lambda i: (i, 0)),
        compiler_params=pltpu.CompilerParams(
            dimension_semantics=("parallel",),
            vmem_limit_bytes=VMEM_LIMIT),
    )(xb, w_p, b_p)
    if Mp != M:
        out = out[:M]
    return out


def batched_matmul_bias_act(x, w_p, b_p, act="none", out_dtype=jnp.float32):
    """Per-domain matmuls in ONE pallas_call: grid over the leading axis.

    x:(D,M,K); w_p:(D,Kp,Np) bf16; b_p:(D,1,Np) f32 -> (D,M,Np)."""
    D, M, K = x.shape
    _, Kp, Np = w_p.shape
    Mp = _round_up(M, 8)
    xb = x.astype(jnp.bfloat16)
    if (Mp, Kp) != (M, K):
        xb = jnp.pad(xb, ((0, 0), (0, Mp - M), (0, Kp - K)))

    out = pl.pallas_call(
        functools.partial(_matmul_bias_act_kernel, act=act),
        out_shape=jax.ShapeDtypeStruct((D, Mp, Np), out_dtype),
        grid=(D,),
        in_specs=[
            pl.BlockSpec((None, Mp, Kp), lambda d: (d, 0, 0)),
            pl.BlockSpec((None, Kp, Np), lambda d: (d, 0, 0)),
            pl.BlockSpec((None, 1, Np), lambda d: (d, 0, 0)),
        ],
        out_specs=pl.BlockSpec((None, Mp, Np), lambda d: (d, 0, 0)),
        compiler_params=pltpu.CompilerParams(
            dimension_semantics=("parallel",),
            vmem_limit_bytes=VMEM_LIMIT),
    )(xb, w_p, b_p)
    if Mp != M:
        out = out[:, :M]
    return out


def _conv3x3_kernel(x_ref, w_ref, b_ref, o_ref, *, H, W, r_img, act, co_chunk):
    # x_ref: (b_img*r_img, Cin) bf16 -- b_img zero-padded images flattened into
    #        one row slab; padded pixel (h', w') of image i sits at flat row
    #        i*r_img + h'*Wp + w', so tap (kh,kw) is one contiguous row shift.
    # w_ref: (9, Cin, Cout) bf16;  b_ref: (1, Cout) f32;  o_ref: (b_img, H*Wp, Cout).
    Wp = W + 2
    R = H * Wp
    b_img = x_ref.shape[0] // r_img
    Cout = o_ref.shape[-1]
    L = (b_img - 1) * r_img + R          # one contiguous run covering every image
    for c0 in range(0, Cout, co_chunk):  # cap accumulator width at large feat
        acc = jnp.zeros((L, co_chunk), jnp.float32)
        for kh in range(3):
            for kw in range(3):
                s = kh * Wp + kw
                acc = acc + jnp.dot(
                    x_ref[s:s + L, :],
                    w_ref[kh * 3 + kw, :, c0:c0 + co_chunk],
                    preferred_element_type=jnp.float32)
        acc = acc + b_ref[:, c0:c0 + co_chunk]
        if act == "leaky_relu":
            acc = _leaky(acc)
        acc = acc.astype(o_ref.dtype)
        for i in range(b_img):           # sublane-aligned (r_img % 8 == 0) extracts
            o_ref[i, :, c0:c0 + co_chunk] = acc[i * r_img:i * r_img + R, :]


def conv2d_3x3_same(x4, w_taps, b_p, act="none", out_dtype=jnp.float32):
    """3x3 conv, stride 1, padding 1, NHWC.

    x4:(N,H,W,Cin_p)  w_taps:(9,Cin_p,Cout_p) bf16  b_p:(1,Cout_p) f32
    -> (N,H,W,Cout_p) out_dtype (channel axis stays 128-padded for chaining).
    All images of one grid step share a single flattened zero-padded row slab,
    so each of the 9 taps is ONE accumulating MXU pass of M = b_img*H*(W+2).
    """
    N, H, W, Cin = x4.shape
    Cout = w_taps.shape[-1]
    Wp = W + 2
    R = H * Wp
    r_img = _round_up((H + 2) * Wp + 2, 8)   # per-image slab rows (covers max tap shift)

    xp = jnp.pad(x4.astype(jnp.bfloat16), ((0, 0), (1, 1), (1, 1), (0, 0)))
    xp = xp.reshape(N, (H + 2) * Wp, Cin)
    xp = jnp.pad(xp, ((0, 0), (0, r_img - (H + 2) * Wp), (0, 0)))
    xp = xp.reshape(N * r_img, Cin)

    # images per grid step: fill the MXU (>=256 rows per tap) but keep >=2 grid
    # steps so v7x's two TensorCores both get work via dimension_semantics.
    b_img = max(1, min(N, -(-256 // R)))
    while N % b_img:
        b_img -= 1
    if N // b_img < 2:
        for cand in range(b_img - 1, 0, -1):
            if N % cand == 0:
                b_img = cand
                break

    co_chunk = min(Cout, 256)   # Cout is a multiple of 128 (prepared weights)
    # NOTE: the constant weight block could be pipeline_mode=pl.Buffered(1) to
    # halve its VMEM at production feat=512; left default-buffered for safety.
    out = pl.pallas_call(
        functools.partial(_conv3x3_kernel, H=H, W=W, r_img=r_img,
                          act=act, co_chunk=co_chunk),
        out_shape=jax.ShapeDtypeStruct((N, R, Cout), out_dtype),
        grid=(N // b_img,),
        in_specs=[
            pl.BlockSpec((b_img * r_img, Cin), lambda n: (n, 0)),
            pl.BlockSpec((9, Cin, Cout), lambda n: (0, 0, 0)),
            pl.BlockSpec((1, Cout), lambda n: (0, 0)),
        ],
        out_specs=pl.BlockSpec((b_img, R, Cout), lambda n: (n, 0, 0)),
        compiler_params=pltpu.CompilerParams(
            dimension_semantics=("parallel",),
            vmem_limit_bytes=VMEM_LIMIT),
    )(xp, w_taps, b_p)
    # lane-dense kernel stores; drop the 2 right-pad junk columns with ONE
    # reshape+slice outside (no in-kernel per-row compaction).
    return out.reshape(N, H, Wp, Cout)[:, :, :W, :]


def _gap_head_kernel(x_ref, w1_ref, b1_ref, w2_ref, b2_ref, o_ref, *, inv_hw):
    # AdaptiveAvgPool2d((1,1)) + Flatten + Linear + LeakyReLU + Linear, fused.
    v = jnp.sum(x_ref[...].astype(jnp.float32), axis=1) * inv_hw      # f32-acc GAP
    h = jnp.dot(v.astype(jnp.bfloat16), w1_ref[...],
                preferred_element_type=jnp.float32) + b1_ref[...]
    h = _leaky(h)
    o_ref[...] = jnp.dot(h.astype(jnp.bfloat16), w2_ref[...],
                         preferred_element_type=jnp.float32) + b2_ref[...]


def gap_head(x3, head):
    """x3:(B, HW, F) -> logits (B, n_out); weights pre-padded/bf16 at prep time."""
    B, HW, F = x3.shape
    out = pl.pallas_call(
        functools.partial(_gap_head_kernel, inv_hw=1.0 / HW),
        out_shape=jax.ShapeDtypeStruct((B, head["n_out_pad"]), jnp.float32),
        compiler_params=pltpu.CompilerParams(vmem_limit_bytes=VMEM_LIMIT),
    )(x3.astype(jnp.bfloat16), head["w1"], head["b1"], head["w2"], head["b2"])
    return out[:, :head["n_out"]]


def _cos_loss_kernel(real_ref, df_ref, f2f_ref, fs_ref, nt_ref, o_ref, acc_ref,
                     *, m_true, rb):
    i = pl.program_id(0)

    @pl.when(i == 0)
    def _():
        acc_ref[...] = jnp.zeros_like(acc_ref)

    eps = 1e-8
    row = i * rb + lax.broadcasted_iota(jnp.int32, (rb, 1), 0)
    valid = row < m_true
    real = real_ref[...]
    rn = real * lax.rsqrt(jnp.sum(real * real, axis=1, keepdims=True) + eps)

    def term(y):
        yn = y * lax.rsqrt(jnp.sum(y * y, axis=1, keepdims=True) + eps)
        cos = jnp.sum(rn * yn, axis=1, keepdims=True)                  # (rb, 1)
        return jnp.sum(jnp.where(valid, 1.0 - cos, 0.0),
                       axis=(0, 1), keepdims=True)                     # (1, 1)

    acc_ref[...] += (term(nt_ref[...]) + term(f2f_ref[...])
                     - term(fs_ref[...]) - term(df_ref[...]))

    @pl.when(i == pl.num_programs(0) - 1)
    def _():
        o_ref[...] = acc_ref[...]


def cosine_group_loss(real, df, f2f, fs, nt):
    # inputs: (G*HW, C) channels-last; cosine over channels per spatial site.
    # Row-tiled grid + VMEM accumulator so it stays VMEM-bounded at ref. scale.
    M, C = real.shape
    rb = min(_round_up(M, 8), 1024)
    Mp = _round_up(M, rb)

    def prep(a):
        a = a.astype(jnp.float32)
        return jnp.pad(a, ((0, Mp - M), (0, 0))) if Mp != M else a

    spec = pl.BlockSpec((rb, C), lambda i: (i, 0))
    out = pl.pallas_call(
        functools.partial(_cos_loss_kernel, m_true=M, rb=rb),
        out_shape=jax.ShapeDtypeStruct((1, 1), jnp.float32),
        grid=(Mp // rb,),
        in_specs=[spec] * 5,
        out_specs=pl.BlockSpec((1, 1), lambda i: (0, 0)),
        scratch_shapes=[pltpu.VMEM((1, 1), jnp.float32)],
        compiler_params=pltpu.CompilerParams(
            dimension_semantics=("arbitrary",),
            vmem_limit_bytes=VMEM_LIMIT),
    )(*[prep(a) for a in (real, df, f2f, fs, nt)])
    return out[0, 0]


def _mse2_kernel(a1_ref, b1_ref, a2_ref, b2_ref, o_ref, acc_ref, *, inv_n1, inv_n2):
    i = pl.program_id(0)

    @pl.when(i == 0)
    def _():
        acc_ref[...] = jnp.zeros_like(acc_ref)

    d1 = a1_ref[...] - b1_ref[...]
    d2 = a2_ref[...] - b2_ref[...]
    acc_ref[...] += (jnp.sum(d1 * d1, axis=(0, 1), keepdims=True) * inv_n1
                     + jnp.sum(d2 * d2, axis=(0, 1), keepdims=True) * inv_n2)

    @pl.when(i == pl.num_programs(0) - 1)
    def _():
        o_ref[...] = acc_ref[...]


def fused_distillation_mse(a1, b1, a2, b2):
    """MSE(a1,b1) + MSE(a2,b2) in a single row-tiled kernel (true element counts;
    zero-padded rows contribute 0 to the sums, divisors are explicit)."""
    M1, C1 = a1.shape
    M2, C2 = a2.shape
    inv_n1 = 1.0 / float(M1 * C1)
    inv_n2 = 1.0 / float(M2 * C2)
    nblk = max(1, -(-max(M1, M2) // 2048))       # common grid for both pairs
    rb1 = _round_up(-(-M1 // nblk), 8)
    rb2 = _round_up(-(-M2 // nblk), 8)

    def prep(a, rb):
        a = a.astype(jnp.float32)
        Mp = nblk * rb
        return jnp.pad(a, ((0, Mp - a.shape[0]), (0, 0))) if Mp != a.shape[0] else a

    out = pl.pallas_call(
        functools.partial(_mse2_kernel, inv_n1=inv_n1, inv_n2=inv_n2),
        out_shape=jax.ShapeDtypeStruct((1, 1), jnp.float32),
        grid=(nblk,),
        in_specs=[
            pl.BlockSpec((rb1, C1), lambda i: (i, 0)),
            pl.BlockSpec((rb1, C1), lambda i: (i, 0)),
            pl.BlockSpec((rb2, C2), lambda i: (i, 0)),
            pl.BlockSpec((rb2, C2), lambda i: (i, 0)),
        ],
        out_specs=pl.BlockSpec((1, 1), lambda i: (0, 0)),
        scratch_shapes=[pltpu.VMEM((1, 1), jnp.float32)],
        compiler_params=pltpu.CompilerParams(
            dimension_semantics=("arbitrary",),
            vmem_limit_bytes=VMEM_LIMIT),
    )(prep(a1, rb1), prep(b1, rb1), prep(a2, rb2), prep(b2, rb2))
    return out[0, 0]


# ----------------------------------------------------------------------------
# Parameters (deterministic synthetic init) + one-time kernel-ready prep
# ----------------------------------------------------------------------------
def init_params(key, feat, backbone_dim, num_domains, bc_hidden=512):
    half = feat // 2
    keys = iter(jax.random.split(key, 64))

    def nrm(shape, scale=0.05):
        return scale * jax.random.normal(next(keys), shape, dtype=jnp.float32)

    def make_encoder():
        # TODO(synk): EfficientNet-b4.extract_features / iresnet100 backbone has no
        # clean Pallas equivalent; replaced by (shared 4x4 avg-pool to 8x8 + learned
        # 1x1 proj) whose two linear stages are precomposed into one matmul.
        return {
            "backbone_w": nrm((backbone_dim, 3, 1, 1)),
            "backbone_b": nrm((backbone_dim,)),
            "head_w": nrm((feat, backbone_dim, 1, 1)),
            "head_b": nrm((feat,)),
        }

    params = {
        "encoders_f": [make_encoder() for _ in range(num_domains - 1)],
        "encoder_c": make_encoder(),
        "student": make_encoder(),
        "fcw": {
            "w1": nrm((feat, 2 * feat, 1, 1)), "b1": nrm((feat,)),
            "w2": nrm((feat, feat, 3, 3)), "b2": nrm((feat,)),
            "w3": nrm((feat, feat, 3, 3)), "b3": nrm((feat,)),
        },
        "mlp": {"w1": nrm((feat, half)), "b1": nrm((half,)),
                "w2": nrm((half, num_domains)), "b2": nrm((num_domains,))},
        "bin": {"w1": nrm((feat, bc_hidden)), "b1": nrm((bc_hidden,)),
                "w2": nrm((bc_hidden, 2)), "b2": nrm((2,))},
    }
    return params


def prepare_params(params, feat):
    """One-time weight prep (outside the per-step path): effective/fused encoder
    weights, bf16 cast, 128-lane padded outputs, conv taps as (9, Cin_p, Cout_p)."""
    featp = _round_up(feat, 128)
    KP_ENC = 16  # K=3 padded for clean bf16 sublane packing

    def enc_eff(enc):
        bb_w = enc["backbone_w"]
        bb = bb_w.shape[0]
        wb2 = bb_w.reshape(bb, 3).T                       # (3, BB)
        wh2 = enc["head_w"].reshape(feat, bb).T           # (BB, feat)
        w_eff = wb2 @ wh2                                 # (3, feat)
        b_eff = enc["backbone_b"] @ wh2 + enc["head_b"]   # (feat,)
        return w_eff, b_eff

    # encoder_c + student fused along the output-channel axis (one dispatch).
    wc, bc = enc_eff(params["encoder_c"])
    ws, bs = enc_eff(params["student"])
    w_cs = jnp.concatenate([wc, ws], axis=1)              # (3, 2*feat)
    b_cs = jnp.concatenate([bc, bs], axis=0)
    ncs = 2 * feat
    ncsp = _round_up(ncs, 128)
    enc_cs = {
        "w": jnp.pad(w_cs.astype(jnp.bfloat16), ((0, KP_ENC - 3), (0, ncsp - ncs))),
        "b": jnp.pad(b_cs.astype(jnp.float32).reshape(1, ncs), ((0, 0), (0, ncsp - ncs))),
    }

    # the 4 domain encoders, stacked for one grid-over-domains dispatch.
    wfs, bfs = zip(*[enc_eff(e) for e in params["encoders_f"]])
    w_f = jnp.stack(wfs)                                  # (D, 3, feat)
    b_f = jnp.stack(bfs)                                  # (D, feat)
    D = w_f.shape[0]
    enc_f = {
        "w": jnp.pad(w_f.astype(jnp.bfloat16), ((0, 0), (0, KP_ENC - 3), (0, featp - feat))),
        "b": jnp.pad(b_f.astype(jnp.float32).reshape(D, 1, feat),
                     ((0, 0), (0, 0), (0, featp - feat))),
    }

    f = params["fcw"]
    k1 = 2 * feat
    k1p = _round_up(k1, 128)
    w1 = f["w1"].reshape(feat, k1).T                      # (2*feat, feat)
    fcw1 = {
        "w": jnp.pad(w1.astype(jnp.bfloat16), ((0, k1p - k1), (0, featp - feat))),
        "b": jnp.pad(f["b1"].astype(jnp.float32).reshape(1, feat),
                     ((0, 0), (0, featp - feat))),
    }

    def conv_taps(w, b):
        cout, cin = w.shape[0], w.shape[1]
        cinp, coutp = _round_up(cin, 128), _round_up(cout, 128)
        taps = jnp.transpose(w, (2, 3, 1, 0)).reshape(9, cin, cout)
        taps = jnp.pad(taps.astype(jnp.bfloat16),
                       ((0, 0), (0, cinp - cin), (0, coutp - cout)))
        bias = jnp.pad(b.astype(jnp.float32).reshape(1, cout), ((0, 0), (0, coutp - cout)))
        return {"w": taps, "b": bias}

    def head(w1, b1, w2, b2):
        h1, n2 = w1.shape[1], w2.shape[1]
        h1p, n2p = _round_up(h1, 128), _round_up(n2, 128)
        return {
            "w1": jnp.pad(w1.astype(jnp.bfloat16), ((0, 0), (0, h1p - h1))),
            "b1": jnp.pad(b1.astype(jnp.float32).reshape(1, h1), ((0, 0), (0, h1p - h1))),
            "w2": jnp.pad(w2.astype(jnp.bfloat16), ((0, h1p - h1), (0, n2p - n2))),
            "b2": jnp.pad(b2.astype(jnp.float32).reshape(1, n2), ((0, 0), (0, n2p - n2))),
            "n_out": n2, "n_out_pad": n2p,
        }

    return {
        "feat": feat, "featp": featp,
        "enc_cs": enc_cs, "enc_f": enc_f,
        "fcw1": fcw1,
        "fcw2": conv_taps(f["w2"], f["b2"]),
        "fcw3": conv_taps(f["w3"], f["b3"]),
        "mlp": head(params["mlp"]["w1"], params["mlp"]["b1"],
                    params["mlp"]["w2"], params["mlp"]["b2"]),
        "bin": head(params["bin"]["w1"], params["bin"]["b1"],
                    params["bin"]["w2"], params["bin"]["b2"]),
    }


# ----------------------------------------------------------------------------
# Host-side glue (RNG augmentation / mixup / cross-entropy)
# ----------------------------------------------------------------------------
def cross_entropy(logits, labels):
    logits = logits.astype(jnp.float32)
    logz = jax.nn.logsumexp(logits, axis=-1)
    ll = jnp.take_along_axis(logits, labels.astype(jnp.int32)[:, None], axis=-1)[:, 0]
    return jnp.mean(logz - ll)


def augment_domains(f_feats, rng, noise_key):
    """Mirrors generator.augment_domains (host `random` -> seeded numpy RNG).

    f_feats: (G, D, HW, C) channels-last.  "Samples" are channel maps (HW,)."""
    G, D, HW, C = f_feats.shape
    domain_means, hard_examples = [], []
    for d in range(D):
        samples = f_feats[:, d]                                    # (G, HW, C)
        mean = jnp.mean(samples, axis=(0, 2))                      # (HW,)
        diffs = samples - mean[None, :, None]
        dists = jnp.sqrt(jnp.sum(diffs * diffs, axis=1))           # (G, C)
        flat = jnp.swapaxes(samples, 1, 2).reshape(G * C, HW)      # order (g, c)
        hard = jnp.take(flat, jnp.argmax(dists.reshape(-1)), axis=0)
        domain_means.append(mean)
        hard_examples.append(hard)

    keys = jax.random.split(noise_key, G * D)
    aug_groups = []
    for g in range(G):
        aug_domains = []
        for d in range(D):
            z = f_feats[g, d]                                      # (HW, C)
            choice = int(rng.integers(0, 4))
            lam = jnp.asarray(rng.random(size=(1, C)), dtype=jnp.float32)
            if choice == 0:      # hard example interpolation
                aug = z + lam * (hard_examples[d][:, None] - z)
            elif choice == 1:    # hard example extrapolation
                aug = z + lam * (z - domain_means[d][:, None])
            elif choice == 2:    # gaussian noise
                sigma = jnp.asarray(rng.random(size=(1, C)), dtype=jnp.float32)
                eps = jax.random.normal(keys[g * D + d], z.shape,
                                        dtype=jnp.float32) * sigma
                aug = z + lam * eps
            else:                # difference transform (channel maps 0 and 1)
                aug = z + lam * (z[:, 0:1] - z[:, 1:2])
            aug_domains.append(aug)
        aug_groups.append(jnp.stack(aug_domains))
    return jnp.stack(aug_groups)


def mixup_in_latent_space(data, rng):
    G, D = data.shape[0], data.shape[1]
    mixed = []
    for i in range(G):
        perm = jnp.asarray(rng.permutation(D))
        alpha = float(rng.random() * 1.5 + 0.5)
        lam = float(rng.beta(alpha, alpha))
        mixed.append(lam * data[i] + (1.0 - lam) * data[i][perm])
    return jnp.stack(mixed)


# ----------------------------------------------------------------------------
# generator.forward (training path, inference=False)
# ----------------------------------------------------------------------------
def generator_forward(prep, cat_data, label, feat, num_domains, rng, aug_key):
    G, V, c, h, w = cat_data.shape
    HW = 64
    featp = prep["featp"]

    # NHWC once + shared stand-in backbone pooling to 8x8 (all encoders use it).
    x_nhwc = jnp.transpose(cat_data, (0, 1, 3, 4, 2))                 # (G,V,H,W,3)
    pooled = x_nhwc.reshape(G, V, 8, h // 8, 8, w // 8, c).mean(axis=(3, 5))
    pooled_flat = pooled.reshape(G, V, HW, c)                         # (G,V,64,3)

    # --- real_fake_feature_extract ---
    # encoder_c + student share weights layout -> ONE matmul with concatenated N.
    cs = matmul_bias_act(pooled_flat.reshape(G * V * HW, c),
                         prep["enc_cs"]["w"], prep["enc_cs"]["b"],
                         act="none", out_dtype=jnp.float32)           # (G*V*64, 2*feat)
    cs = cs.reshape(G, V, HW, 2 * feat)
    c_feats = cs[..., :feat]                                          # (G,V,64,feat)
    student = cs[..., feat:2 * feat]                                  # (G,V,64,feat)

    # 4 domain-specific encoders in ONE pallas_call (grid over domains).
    xf = jnp.transpose(pooled_flat[:, 1:], (1, 0, 2, 3)).reshape(V - 1, G * HW, c)
    f_out = batched_matmul_bias_act(xf, prep["enc_f"]["w"], prep["enc_f"]["b"],
                                    act="none", out_dtype=jnp.float32)
    f_feats = jnp.transpose(f_out[..., :feat].reshape(V - 1, G, HW, feat),
                            (1, 0, 2, 3))                             # (G,V-1,64,feat)

    # --- latent augmentation / mixup (host RNG glue) ---
    f_aug = augment_domains(f_feats, rng, aug_key)
    f_mix = mixup_in_latent_space(f_feats, rng)
    aug_fake = jnp.concatenate([f_aug, f_mix], axis=-1).reshape(G * (V - 1) * HW,
                                                                2 * feat)

    # --- fc_weights: 1x1 conv + 2x fused 3x3 conv ---
    # bf16 + 128-padded channels carried through the chain; f32 only at the end
    # (the output feeds the f32 MSE loss kernel).
    n_imgs = G * (V - 1)
    y = matmul_bias_act(aug_fake, prep["fcw1"]["w"], prep["fcw1"]["b"],
                        act="leaky_relu", out_dtype=jnp.bfloat16)     # (M, featp)
    y = y.reshape(n_imgs, 8, 8, featp)
    y = conv2d_3x3_same(y, prep["fcw2"]["w"], prep["fcw2"]["b"],
                        act="leaky_relu", out_dtype=jnp.bfloat16)
    y = conv2d_3x3_same(y, prep["fcw3"]["w"], prep["fcw3"]["b"],
                        act="leaky_relu", out_dtype=jnp.float32)
    fc = y[..., :feat].reshape(G, V - 1, HW, feat)

    # --- cosine similarity loss between real and the four fake domains ---
    real, df, f2f, fs, nt = (c_feats[:, i].reshape(G * HW, feat) for i in range(5))
    loss_real = cosine_group_loss(real, df, f2f, fs, nt)  # .mean() on scalar is a no-op

    label_flat = label.reshape(-1)
    binary_label = jnp.where(label_flat == 0, 0, 1)

    # --- student branch ---
    student_flat = student.reshape(G * V, HW, feat)
    binary_out = gap_head(student_flat, prep["bin"])
    deepfake_loss = cross_entropy(binary_out, binary_label)

    # label layout is [0,1,...,V-1] per group, so real/fake boolean masks are
    # equivalent to per-group slicing of domain 0 vs. domains 1..V-1.
    sf = student.reshape(G, V, HW, feat)
    total_loss_distillation = fused_distillation_mse(
        sf[:, 0].reshape(G * HW, feat), c_feats[:, 0].reshape(G * HW, feat),
        sf[:, 1:].reshape(G * (V - 1) * HW, feat), fc.reshape(G * (V - 1) * HW, feat))

    # --- domain classification head ---
    all_domain_feat = jnp.concatenate([c_feats[:, 0:1], f_feats], axis=1
                                      ).reshape(G * V, HW, feat)
    out_spe = gap_head(all_domain_feat, prep["mlp"])
    domain_loss = cross_entropy(out_spe, label_flat)

    # return student_feature in the original NCHW layout
    student_feature = jnp.transpose(student_flat.reshape(G * V, 8, 8, feat),
                                    (0, 3, 1, 2))
    return (binary_out, deepfake_loss, total_loss_distillation,
            domain_loss, loss_real, student_feature)


# ----------------------------------------------------------------------------
if __name__ == "__main__":
    G, V = 2, 5                 # number_of_groups, video_per_group (= num_domains)
    C_IN, H_IN, W_IN = 3, 32, 32
    FEAT = 64                   # encoder_feat_dim (512 in the reference, scaled down)
    BACKBONE = 32               # stand-in backbone channel dim (1792 in the reference)
    NUM_DOMAINS = 5

    key = jax.random.PRNGKey(0)
    k_data, k_param, k_aug = jax.random.split(key, 3)

    cat_data = jax.random.normal(k_data, (G, V, C_IN, H_IN, W_IN), dtype=jnp.float32)
    label = jnp.tile(jnp.arange(V, dtype=jnp.int32), (G, 1))   # domain id per video

    params = init_params(k_param, FEAT, BACKBONE, NUM_DOMAINS)
    prep = prepare_params(params, FEAT)        # one-time: pad / cast / fuse weights
    rng = np.random.default_rng(0)

    outs = generator_forward(prep, cat_data, label, FEAT, NUM_DOMAINS, rng, k_aug)
    jax.block_until_ready(outs)
    print("KERNEL_OK")
</pallas_src>

<mosaic_0001>
module attributes {stable_mosaic.version = 11 : i64} {
  func.func @_matmul_bias_act_kernel(%arg0: i32, %arg1: memref<256x16xbf16, #tpu.memory_space<vmem>>, %arg2: memref<16x128xbf16, #tpu.memory_space<vmem>>, %arg3: memref<1x128xf32, #tpu.memory_space<vmem>>, %arg4: memref<256x128xf32, #tpu.memory_space<vmem>>) attributes {dimension_semantics = [#tpu.dimension_semantics<parallel>], iteration_bounds = array<i64: 3>, scalar_prefetch = 0 : i64, scratch_operands = 0 : i64, tpu.core_type = #tpu.core_type<tc>, window_params = [{transform_indices = @transform_0, window_bounds = array<i64: 256, 16>}, {pipeline_mode = #tpu.pipeline_mode<synchronous>, transform_indices = @transform_1, window_bounds = array<i64: 16, 128>}, {pipeline_mode = #tpu.pipeline_mode<synchronous>, transform_indices = @transform_2, window_bounds = array<i64: 1, 128>}, {transform_indices = @transform_3, window_bounds = array<i64: 256, 128>}]} {
    %c0 = arith.constant 0 : index
    %c0_0 = arith.constant 0 : index
    %0 = vector.load %arg1[%c0, %c0_0] : memref<256x16xbf16, #tpu.memory_space<vmem>>, vector<256x16xbf16>
    %c0_1 = arith.constant 0 : index
    %c0_2 = arith.constant 0 : index
    %1 = vector.load %arg2[%c0_1, %c0_2] : memref<16x128xbf16, #tpu.memory_space<vmem>>, vector<16x128xbf16>
    %cst = arith.constant dense<0.000000e+00> : vector<256x128xf32>
    %2 = tpu.matmul %0, %1, %cst {dimension_numbers = #tpu.dot_dimension_numbers<[1], [0], [0], [1], [0, 0, 1, 1], [], []>} : vector<256x16xbf16>, vector<16x128xbf16>, vector<256x128xf32> -> vector<256x128xf32>
    %c0_3 = arith.constant 0 : index
    %c0_4 = arith.constant 0 : index
    %3 = vector.load %arg3[%c0_3, %c0_4] : memref<1x128xf32, #tpu.memory_space<vmem>>, vector<1x128xf32>
    %4 = vector.broadcast %3 : vector<1x128xf32> to vector<256x128xf32>
    %5 = arith.addf %2, %4 : vector<256x128xf32>
    %c0_5 = arith.constant 0 : index
    %c0_6 = arith.constant 0 : index
    %6 = vector.load %arg4[%c0_5, %c0_6] : memref<256x128xf32, #tpu.memory_space<vmem>>, vector<256x128xf32>
    tpu.vector_store %arg4[%c0_5, %c0_6], %5 {strides = array<i32>} : memref<256x128xf32, #tpu.memory_space<vmem>>, vector<256x128xf32>,
    return
  }
  func.func @transform_0(%arg0: i32) -> (i32, i32) {
    %c0_i32 = arith.constant 0 : i32
    %c0_i32_0 = arith.constant 0 : i32
    return %arg0, %c0_i32 : i32, i32
  }
  func.func @transform_1(%arg0: i32) -> (i32, i32) {
    %c0_i32 = arith.constant 0 : i32
    %c0_i32_0 = arith.constant 0 : i32
    %c0_i32_1 = arith.constant 0 : i32
    return %c0_i32, %c0_i32_0 : i32, i32
  }
  func.func @transform_2(%arg0: i32) -> (i32, i32) {
    %c0_i32 = arith.constant 0 : i32
    %c0_i32_0 = arith.constant 0 : i32
    %c0_i32_1 = arith.constant 0 : i32
    return %c0_i32, %c0_i32_0 : i32, i32
  }
  func.func @transform_3(%arg0: i32) -> (i32, i32) {
    %c0_i32 = arith.constant 0 : i32
    %c0_i32_0 = arith.constant 0 : i32
    return %arg0, %c0_i32 : i32, i32
  }
}

</mosaic_0001>

<bundles_post_ra>
// kernel: tpu_custom_call.1
= control target key start
LH: loop header
LB: loop body
LE: loop exit
PB: predicated region body
PF: predicated region fallthrough
CT: control target
= control target key end

     0   :  { %8 = vsyncpa [#allocation3], 0  ;;  %s1078_s0 = inlined_call_operand.vmem [shape: bf16[768,16], index: 0, kind: input, shape index: {}]   ;;  %s1079_s1 = inlined_call_operand.vmem [shape: bf16[16,128], index: 1, kind: input, shape index: {}]   ;;  %s1080_s2 = inlined_call_operand.vmem [shape: f32[1,128], index: 2, kind: input, shape index: {}]   ;;  %s1081_s3 = inlined_call_operand.hbm [shape: f32[768,128], index: 3, kind: output, shape index: {}]  }
   0x1   :  { %10 = vsyncpa [#allocation3 + $0x1], 0  ;;  %s863_s12 = smov 0   ;;  %s865_s13 = smov 0  }
   0x2   :  { %s867_s14 = smov 0   ;;  %s869_s15 = smov 0  }
   0x3 LB: > { %s884_s16 = sadd.s32 4294967295, %s838_s15   ;;  %s618_s17 = sadd.s32 4294967294, %s838_s15   ;;  %s838_s15 = sphi %s869_s15, %s1087_s15   ;;  %s834_s14 = sphi %s867_s14, %s1086_s14   ;;  %s830_s13 = sphi %s865_s13, %s1085_s13   ;;  %s826_s12 = sphi %s863_s12, %s1084_s12  }
   0x4   : > { %s888_s18 = sadd.s32 1, %s838_s15   ;;  %s91_s19 = sadd.s32 1, %s834_s14 }
   0x5   : > { %s88_s20 = ssub.s32 %s838_s15, %s888_s18  ;;  %p101_p0 = scmp.ne.s32.totalorder %s834_s14, %s830_s13 }
   0x6   : > { %p89_p1 = scmp.eq.s32.totalorder %s88_s20, 0  ;;  %p102_p2 = scmp.eq.s32.totalorder %s884_s16, 2 }
   0x7   : > { %p107_p3 = scmp.ne.s32.totalorder %s830_s13, %s826_s12  ;;  %p108_p4 = scmp.eq.s32.totalorder %s618_s17, 2 }
   0x8   : > { %s899_s21 = scalar_select %p89_p1, %s834_s14, %s91_s19  }
   0x9   : > { %p901_p5 = por %p102_p2, %p101_p0  ;;  %p905_p6 = por %p108_p4, %p107_p3 }
   0xa   : > { %p621_p7 = scmp.ge.s32.totalorder %s838_s15, 1  ;;  %p141_p8 = scmp.lt.s32.totalorder %s838_s15, 4 }
   0xc   : > { %p142_p9 = pnand %p621_p7, %p141_p8 }
   0xd   : > { %v759_v0 = vld [vmem:[%s1079_s1] sm:$0xff] (!%p142_p9)   ;;  %s623_s26 = sshll.u32 (!%p142_p9), %s884_s16, 5  ;;  %vm300_vm0 = vcmask (!%p142_p9), 130048   ;;  %s162_s4 = sand.u32 (!%p142_p9), 1, %s830_s13  }
   0xe   : > { %145 = sbr.rel (%p142_p9) target bundleno = 283 (0x11b), region = 32  ;;  %p166_p10 = scmp.lt.s32.totalorder (!%p142_p9), %s623_s26, 95  ;;  %682 = vmatprep.subr.bf16.mxu0 (!%p142_p9), %v759_v0  ;;  %716 = vmatprep.subr.bf16.mxu1 (!%p142_p9), %v759_v0  ;;  %v958_v17 = vld [vmem:[%s1080_s2] ss:$0 sm:$0xff] (!%p142_p9) }
   0xf   : > { %683 = vmatpush3.bf16.msra.mxu0 (!%p142_p9), %v759_v0  ;;  %717 = vmatpush3.bf16.msra.mxu1 (!%p142_p9), %v759_v0  ;;  %s622_s5 = sshll.u32 (!%p142_p9), %s162_s4, 8  ;;  %s664_s9 = sshll.u32 (!%p142_p9), %s884_s16, 12 }
  0x10   : > { %s963_s8 = scalar_lea.vmem (!%p142_p9), [#allocation2], %s622_s5  ;;  %s1025_s17 = scalar_lea.hbm (!%p142_p9), %s1081_s3, %s664_s9 }
  0x11   : > { %s556_s10 = sshll.u32 (!%p142_p9), %s963_s8, 4  ;;  %s1037_s19 = scalar_lea.sflag (!%p142_p9), [#allocation3], %s162_s4  ;;  %s1027_s10 = int_to_ptr.vmem [resolvable:$true] %s556_s10 }
  0x12   : > { %s776_s20 = scalar_lea.vmem (!%p142_p9), %s1027_s10, 4096  ;;  %s840_s24 = smov (!%p142_p9), [#allocation2]  }
  0x13   : > { %p777_p11 = scmp.ne.s32.totalorder (!%p142_p9), %s1027_s10, %s776_s20  ;;  %s780_s25 = sshll.u32 (!%p142_p9), %s840_s24, 4  ;;  %s781_s25 = int_to_ptr.vmem [resolvable:$false] %s780_s25 }
  0x14   : > { %p783_p0 = scmp.lt.s32.totalorder (!%p142_p9), %s1027_s10, %s781_s25 }
  0x15   : > { %s1089_s26 = smov (!%p166_p10, %s623_s26), 95  ;;  %p778_p12 = pnand %p777_p11, %p901_p5 }
  0x16   : > { %s624_s27 = sshll.u32 %s1089_s26, 2  ;;  %s782_s26 = scalar_lea.vmem %s781_s25, 8192 }
  0x17   : > { %s918_s30 = scalar_lea.vmem %s1078_s0, %s624_s27  ;;  %p779_p13 = pneg %p778_p12 }
  0x18   : > { %v760_v1 = vld [vmem:[%s918_s30] sm:$0xff]   ;;  %v762_v3 = vld [vmem:[%s918_s30 + $0x8] sm:$0xff]   ;;  %v764_v5 = vld [vmem:[%s918_s30 + $0x10] sm:$0xff]   ;;  %p784_p1 = scmp.lt.s32.totalorder %s782_s26, %s776_s20 }
  0x19   : > { %v761_v2 = vld [vmem:[%s918_s30 + $0x40] sm:$0xff]   ;;  %684 = vmatprep.mubr.msk.bf16.mxu0 %vm300_vm0, %v760_v1  ;;  %v763_v4 = vld [vmem:[%s918_s30 + $0x48] sm:$0xff]   ;;  %v765_v6 = vld [vmem:[%s918_s30 + $0x50] sm:$0xff]  }
  0x1a   : > { %700 = vmatprep.mubr.msk.bf16.mxu1 %vm300_vm0, %v761_v2  ;;  %685 = vmatmul.mubr.msk.bf16.vlgmr.msra.gmra.mrb[0].mxu0 %vm300_vm0, %v762_v3  ;;  %v766_v7 = vld [vmem:[%s918_s30 + $0x18] sm:$0xff]   ;;  %v768_v9 = vld [vmem:[%s918_s30 + $0x20] sm:$0xff]   ;;  %v770_v11 = vld [vmem:[%s918_s30 + $0x28] sm:$0xff]   ;;  %p785_p2 = por %p784_p1, %p783_p0 }
  0x1b   : > { %701 = vmatmul.mubr.msk.bf16.vlgmr.msra.gmra.mrb[0].mxu1 %vm300_vm0, %v763_v4  ;;  %688 = vmatprep.mubr.msk.bf16.mxu0 %vm300_vm0, %v764_v5  ;;  %v767_v8 = vld [vmem:[%s918_s30 + $0x58] sm:$0xff]   ;;  %v769_v10 = vld [vmem:[%s918_s30 + $0x60] sm:$0xff]   ;;  %v771_v12 = vld [vmem:[%s918_s30 + $0x68] sm:$0xff]  }
  0x1c   : > { %704 = vmatprep.mubr.msk.bf16.mxu1 %vm300_vm0, %v765_v6  ;;  %v772_v13 = vld [vmem:[%s918_s30 + $0x30] sm:$0xff]   ;;  %v774_v15 = vld [vmem:[%s918_s30 + $0x38] sm:$0xff]   ;;  %p786_p3 = pnand %p785_p2, %p779_p13 }
  0x1d   : > { %v773_v14 = vld [vmem:[%s918_s30 + $0x70] sm:$0xff]   ;;  %v775_v16 = vld [vmem:[%s918_s30 + $0x78] sm:$0xff]  }
  0x22   : > { %689 = vmatmul.mubr.msk.bf16.gmra.mrb[4].mxu0 %vm300_vm0, %v766_v7 }
  0x23   : > { %705 = vmatmul.mubr.msk.bf16.gmra.mrb[4].mxu1 %vm300_vm0, %v767_v8  ;;  %692 = vmatprep.mubr.msk.bf16.mxu0 %vm300_vm0, %v768_v9 }
  0x24   : > { %708 = vmatprep.mubr.msk.bf16.mxu1 %vm300_vm0, %v769_v10 }
  0x2a   : > { %693 = vmatmul.mubr.msk.bf16.gmra.mrb[8].mxu0 %vm300_vm0, %v770_v11 }
  0x2b   : > { %709 = vmatmul.mubr.msk.bf16.gmra.mrb[8].mxu1 %vm300_vm0, %v771_v12  ;;  %696 = vmatprep.mubr.msk.bf16.mxu0 %vm300_vm0, %v772_v13 }
  0x2c   : > { %712 = vmatprep.mubr.msk.bf16.mxu1 %vm300_vm0, %v773_v14 }
  0x32   : > { %697 = vmatmul.mubr.msk.bf16.gmra.mrb[12].mxu0 %vm300_vm0, %v774_v15 }
  0x33   : > { %713 = vmatmul.mubr.msk.bf16.gmra.mrb[12].mxu1 %vm300_vm0, %v775_v16 }
  0xed   : > { %v686_v18 = vpop.f32.mrb[0].mxu0 }
  0xee   : > { %v392_v19 = vadd.f32 %v686_v18, %v958_v17  ;;  %v702_v20 = vpop.f32.mrb[0].mxu1  ;;  %v383_v21 = vpop.f32.mrb[1].mxu0 }
  0xef   : > { %v456_v22 = vadd.f32 %v702_v20, %v958_v17  ;;  %v384_v23 = vadd.f32 %v958_v17, %v383_v21  ;;  %v447_v24 = vpop.f32.mrb[1].mxu1  ;;  %v687_v25 = vpop.f32.mrb[2].mxu0 }
  0xf0   : > { %512 = vst [vmem:[%s963_s8 + $0x10] sm:$0xff] %v392_v19  ;;  %v448_v26 = vadd.f32 %v958_v17, %v447_v24  ;;  %v395_v27 = vadd.f32 %v687_v25, %v958_v17  ;;  %v703_v28 = vpop.f32.mrb[2].mxu1  ;;  %v386_v29 = vpop.f32.mrb[3].mxu0 }
  0xf1   : > { %528 = vst [vmem:[%s963_s8 + $0x90] sm:$0xff] %v456_v22  ;;  %510 = vst [vmem:[%s963_s8] sm:$0xff] %v384_v23  ;;  %v459_v30 = vadd.f32 %v703_v28, %v958_v17  ;;  %v387_v31 = vadd.f32 %v958_v17, %v386_v29  ;;  %v450_v32 = vpop.f32.mrb[3].mxu1 }
  0xf2   : > { %526 = vst [vmem:[%s963_s8 + $0x80] sm:$0xff] %v448_v26  ;;  %513 = vst [vmem:[%s963_s8 + $0x18] sm:$0xff] %v395_v27  ;;  %v451_v33 = vadd.f32 %v958_v17, %v450_v32 }
  0xf3   : > { %529 = vst [vmem:[%s963_s8 + $0x98] sm:$0xff] %v459_v30  ;;  %511 = vst [vmem:[%s963_s8 + $0x8] sm:$0xff] %v387_v31 }
  0xf4   : > { %527 = vst [vmem:[%s963_s8 + $0x88] sm:$0xff] %v451_v33 }
  0xf5   : > { %v690_v34 = vpop.f32.mrb[4].mxu0 }
  0xf6   : > { %v408_v35 = vadd.f32 %v690_v34, %v958_v17  ;;  %v706_v36 = vpop.f32.mrb[4].mxu1  ;;  %v399_v37 = vpop.f32.mrb[5].mxu0 }
  0xf7   : > { %v472_v38 = vadd.f32 %v706_v36, %v958_v17  ;;  %v400_v39 = vadd.f32 %v958_v17, %v399_v37  ;;  %v463_v40 = vpop.f32.mrb[5].mxu1  ;;  %v691_v41 = vpop.f32.mrb[6].mxu0 }
  0xf8   : > { %516 = vst [vmem:[%s963_s8 + $0x30] sm:$0xff] %v408_v35  ;;  %v464_v42 = vadd.f32 %v958_v17, %v463_v40  ;;  %v411_v43 = vadd.f32 %v691_v41, %v958_v17  ;;  %v707_v44 = vpop.f32.mrb[6].mxu1  ;;  %v402_v45 = vpop.f32.mrb[7].mxu0 }
  0xf9   : > { %532 = vst [vmem:[%s963_s8 + $0xb0] sm:$0xff] %v472_v38  ;;  %514 = vst [vmem:[%s963_s8 + $0x20] sm:$0xff] %v400_v39  ;;  %v475_v46 = vadd.f32 %v707_v44, %v958_v17  ;;  %v403_v47 = vadd.f32 %v958_v17, %v402_v45  ;;  %v466_v48 = vpop.f32.mrb[7].mxu1 }
  0xfa   : > { %530 = vst [vmem:[%s963_s8 + $0xa0] sm:$0xff] %v464_v42  ;;  %517 = vst [vmem:[%s963_s8 + $0x38] sm:$0xff] %v411_v43  ;;  %v467_v49 = vadd.f32 %v958_v17, %v466_v48 }
  0xfb   : > { %533 = vst [vmem:[%s963_s8 + $0xb8] sm:$0xff] %v475_v46  ;;  %515 = vst [vmem:[%s963_s8 + $0x28] sm:$0xff] %v403_v47 }
  0xfc   : > { %531 = vst [vmem:[%s963_s8 + $0xa8] sm:$0xff] %v467_v49 }
  0xfd   : > { %v694_v50 = vpop.f32.mrb[8].mxu0 }
  0xfe   : > { %v424_v51 = vadd.f32 %v694_v50, %v958_v17  ;;  %v710_v52 = vpop.f32.mrb[8].mxu1  ;;  %v415_v53 = vpop.f32.mrb[9].mxu0 }
  0xff   : > { %v488_v54 = vadd.f32 %v710_v52, %v958_v17  ;;  %v416_v55 = vadd.f32 %v958_v17, %v415_v53  ;;  %v479_v56 = vpop.f32.mrb[9].mxu1  ;;  %v695_v57 = vpop.f32.mrb[10].mxu0 }
 0x100   : > { %520 = vst [vmem:[%s963_s8 + $0x50] sm:$0xff] %v424_v51  ;;  %v480_v58 = vadd.f32 %v958_v17, %v479_v56  ;;  %v427_v59 = vadd.f32 %v695_v57, %v958_v17  ;;  %v711_v60 = vpop.f32.mrb[10].mxu1  ;;  %v418_v61 = vpop.f32.mrb[11].mxu0 }
 0x101   : > { %536 = vst [vmem:[%s963_s8 + $0xd0] sm:$0xff] %v488_v54  ;;  %518 = vst [vmem:[%s963_s8 + $0x40] sm:$0xff] %v416_v55  ;;  %v491_v62 = vadd.f32 %v711_v60, %v958_v17  ;;  %v419_v63 = vadd.f32 %v958_v17, %v418_v61  ;;  %v482_v0 = vpop.f32.mrb[11].mxu1 }
 0x102   : > { %534 = vst [vmem:[%s963_s8 + $0xc0] sm:$0xff] %v480_v58  ;;  %521 = vst [vmem:[%s963_s8 + $0x58] sm:$0xff] %v427_v59  ;;  %v483_v1 = vadd.f32 %v958_v17, %v482_v0 }
 0x103   : > { %537 = vst [vmem:[%s963_s8 + $0xd8] sm:$0xff] %v491_v62  ;;  %519 = vst [vmem:[%s963_s8 + $0x48] sm:$0xff] %v419_v63 }
 0x104   : > { %535 = vst [vmem:[%s963_s8 + $0xc8] sm:$0xff] %v483_v1 }
 0x105   : > { %v698_v2 = vpop.f32.mrb[12].mxu0 }
 0x106   : > { %v440_v3 = vadd.f32 %v698_v2, %v958_v17  ;;  %v714_v4 = vpop.f32.mrb[12].mxu1  ;;  %v431_v5 = vpop.f32.mrb[13].mxu0 }
 0x107   : > { %v504_v6 = vadd.f32 %v714_v4, %v958_v17  ;;  %v432_v7 = vadd.f32 %v958_v17, %v431_v5  ;;  %v495_v8 = vpop.f32.mrb[13].mxu1  ;;  %v699_v9 = vpop.f32.mrb[14].mxu0 }
 0x108   : > { %524 = vst [vmem:[%s963_s8 + $0x70] sm:$0xff] %v440_v3  ;;  %v496_v10 = vadd.f32 %v958_v17, %v495_v8  ;;  %v443_v11 = vadd.f32 %v699_v9, %v958_v17  ;;  %v715_v12 = vpop.f32.mrb[14].mxu1  ;;  %v434_v13 = vpop.f32.mrb[15].mxu0 }
 0x109   : > { %540 = vst [vmem:[%s963_s8 + $0xf0] sm:$0xff] %v504_v6  ;;  %522 = vst [vmem:[%s963_s8 + $0x60] sm:$0xff] %v432_v7  ;;  %v507_v14 = vadd.f32 %v715_v12, %v958_v17  ;;  %v435_v15 = vadd.f32 %v958_v17, %v434_v13  ;;  %v498_v16 = vpop.f32.mrb[15].mxu1 }
 0x10a   : > { %538 = vst [vmem:[%s963_s8 + $0xe0] sm:$0xff] %v496_v10  ;;  %525 = vst [vmem:[%s963_s8 + $0x78] sm:$0xff] %v443_v11  ;;  %v499_v18 = vadd.f32 %v958_v17, %v498_v16 }
 0x10b   : > { %541 = vst [vmem:[%s963_s8 + $0xf8] sm:$0xff] %v507_v14  ;;  %523 = vst [vmem:[%s963_s8 + $0x68] sm:$0xff] %v435_v15 }
 0x10c   : > { %539 = vst [vmem:[%s963_s8 + $0xe8] sm:$0xff] %v499_v18 }
 0x10d   : > { %789 = shalt.err (!%p786_p3)
}
 0x10e   : > { %s790_s27 = scalar_lea.hbm %s1025_s17, 4096  ;;  %s794_s30 = scalar_lea.hbm %s1081_s3, 12288 }
 0x10f   : > { %p791_p4 = scmp.ne.s32.totalorder %s1025_s17, %s790_s27  ;;  %p795_p9 = scmp.lt.u32.totalorder %s1025_s17, %s1081_s3 }
 0x110   : > { %p796_p10 = scmp.lt.u32.totalorder %s794_s30, %s790_s27  ;;  %p798_p12 = scmp.lt.u32.totalorder %s790_s27, %s1025_s17 }
 0x111   : > { %p792_p7 = pnand %p791_p4, %p901_p5 }
 0x112   : > { %p797_p11 = por %p796_p10, %p795_p9 }
 0x113   : > { %p793_p8 = pneg %p792_p7 }
 0x114   : > { %p799_p13 = por %p798_p12, %p797_p11 }
 0x116   : > { %p800_p0 = pnand %p799_p13, %p793_p8 }
 0x118   : > { %803 = shalt.err (!%p800_p0)
}
 0x119   : > { %s841_s6 = smov 128   ;;  %s842_s7 = smov 8  }
 0x11a   : > { %718 = dma.vmem_to_hbm [thread:$0]  (%p901_p5), %s1027_s10, 4096, %s1025_s17, %s1037_s19, %s841_s6, %s841_s6, %s842_s7  }
 0x11b PF: > { %p724_p1 = scmp.ge.s32.totalorder %s838_s15, 2  ;;  %s571_s8 = sand.u32 1, %s826_s12  }
 0x11c   : > { %s572_s9 = scalar_lea.sflag [#allocation3], %s571_s8 }
 0x11d   : > { %p721_p2 = pnand %p724_p1, %p905_p6 }
 0x11f   : > { %821 = dma.done.wait (!%p721_p2), %s572_s9, 4096  }
 0x120   : > { %823 = vsyncadd (!%p721_p2), %s572_s9, 4294963200  ;;  %p13_p3 = scmp.ge.s32.totalorder %s888_s18, 5   ;;  %s1084_s12 = smov %s830_s13 }
 0x121   : > { %s1085_s13 = smov %s834_s14  ;;  %s1086_s14 = smov %s899_s21 }
 0x122   : > { %s1087_s15 = smov %s888_s18  ;;  %15 = sbr.rel (!%p13_p3) target bundleno = 3 (0x3), region = 67 }
 0x129   :  { %577 = vsyncpa [#allocation3], 1 }
 0x12a   :  { %579 = vsyncpa [#allocation3 + $0x1], 1 }

</bundles_post_ra>
